<compile_context>
chip_gen: v5e
topology: v5e:2x2
jax: 0.10.0
libtpu: 0.0.40
codegen_flags: <defaults>
</compile_context>

<pallas_src>
import functools
import math

import jax
import jax.numpy as jnp
from jax.experimental import pallas as pl
from jax.experimental.pallas import tpu as pltpu


# ---------------------------------------------------------------------------
# Fused Pallas kernel: MLP(x1) -> k, MLP(x2) -> q (scale pre-folded),
# batched dot-product attention + softmax, @ r.  One pallas_call gridded over
# batch tiles; the tiny MLP weights stay VMEM-resident via constant index_maps.
# ---------------------------------------------------------------------------
def _fused_attention_kernel(x1_ref, x2_ref, r_ref, *rest,
                            n_layers, bb, nc, nt, normalise, compute_dtype,
                            approx_recip):
    o_ref = rest[-1]
    w_refs = rest[:-1]                       # 2*n_layers (w, b) refs per side
    k_side = w_refs[:2 * n_layers]           # keys   MLP (linear_layers_list)
    q_side = w_refs[2 * n_layers:]           # query  MLP (linear_layers_list2)

    def mlp(x, side):
        h = x
        for i in range(n_layers):
            w = side[2 * i][...]
            b = side[2 * i + 1][...]
            h = jax.lax.dot_general(
                h, w, (((1,), (0,)), ((), ())),
                preferred_element_type=jnp.float32) + b.astype(jnp.float32)
            if i < n_layers - 1:
                # Elementwise ReLU stays in f32 (v5e VPU has no bf16 path);
                # only the next MXU operand is cast to compute_dtype.
                h = jnp.maximum(h, 0.0).astype(compute_dtype)
        return h                              # (rows, d_k), float32

    # MLPs on flattened (bb*set, feature) 2-D tiles -> large MXU M-dim.
    k2d = mlp(x1_ref[...], k_side)                        # (bb*nc, dk), f32
    q2d = mlp(x2_ref[...], q_side)                        # (bb*nt, dk), f32 (1/scale folded)

    dk = k2d.shape[-1]
    # nc / nt are sublane-tile multiples (checked host-side), so splitting the
    # major dim is a layout-preserving (metadata-only) reshape.
    kb = k2d.reshape(bb, nc, dk).astype(compute_dtype)
    qb = q2d.reshape(bb, nt, dk).astype(compute_dtype)

    # Batched q @ k^T: contract last dims, batch dim 0 (no explicit transpose).
    s = jax.lax.dot_general(qb, kb, (((2,), (2,)), ((0,), (0,))),
                            preferred_element_type=jnp.float32)   # (bb, nt, nc)
    if normalise:
        m = jnp.max(s, axis=-1, keepdims=True)
        p = jnp.exp(s - m)
        denom = jnp.sum(p, axis=-1, keepdims=True)
        wgt = p * pl.reciprocal(denom, approx=approx_recip)       # EUP slot
    else:
        wgt = jax.nn.sigmoid(s)

    rb = r_ref[...]                                               # (bb, nc, dv)
    out = jax.lax.dot_general(wgt.astype(rb.dtype), rb,
                              (((2,), (1,)), ((0,), (0,))),
                              preferred_element_type=jnp.float32)  # (bb, nt, dv)
    # Single whole-tile store (one store per grid step, not bb masked stores).
    o_ref[...] = out.astype(o_ref.dtype)


# ---------------------------------------------------------------------------
# Hardware detection + batch-tile selection
# ---------------------------------------------------------------------------
def _detect_tpu():
    """Returns (num_tensorcores, physical_vmem_bytes) with safe fallbacks."""
    vmem_cap = 64 * 1024 * 1024          # conservative floor (v7x-sized)
    num_tc = 1
    try:
        info = pltpu.get_tpu_info()
        vmem_cap = int(getattr(info, "vmem_capacity_bytes", vmem_cap) or vmem_cap)
        num_tc = int(getattr(info, "num_cores",
                             getattr(info, "tensor_cores_per_chip", num_tc))
                     or num_tc)
    except Exception:
        pass
    try:
        dev = jax.local_devices()[0]
        num_tc = max(num_tc, int(getattr(dev, "num_cores", 1) or 1))
    except Exception:
        pass
    return num_tc, vmem_cap


def _pick_batch_tile(batch, nc, nt, f1, f2, dv, in_itemsize, weight_bytes,
                     *, num_tc, vmem_budget, sublane):
    """Largest batch tile that (a) divides batch, (b) keeps block second-minor
    dims sublane-aligned, (c) fits the double-buffered VMEM budget, and
    (d) leaves >= num_tc grid steps when the part has more than one TC."""
    def fits(bb):
        if batch % bb:
            return False
        if bb != batch and ((bb * nc) % sublane or (bb * nt) % sublane):
            return False
        tile_bytes = bb * (nc * f1 + nt * f2 + nc * dv) * in_itemsize   # inputs
        tile_bytes += bb * nt * dv * 4                                  # f32 out
        return 2 * tile_bytes + 2 * weight_bytes <= vmem_budget

    cands = [bb for bb in range(1, batch + 1) if fits(bb)]
    if not cands:
        return batch                      # full-batch step (blocks == full dims)
    if num_tc >= 2:
        multi = [bb for bb in cands if batch // bb >= num_tc]
        if multi:
            return max(multi)             # keep every TensorCore busy
    return max(cands)                     # single TC: biggest resident tile wins


# ---------------------------------------------------------------------------
# Wrapper
# ---------------------------------------------------------------------------
def attention_forward(params, x1, x2, r, *, normalise=True,
                      compute_dtype=jnp.float32, batch_tile=None,
                      approx_reciprocal=True):
    """x1: (B, Nc, F) keys input, x2: (B, Nt, F) queries input, r: (B, Nc, Dv)."""
    B, Nc, F1 = x1.shape
    _, Nt, F2 = x2.shape
    Dv = r.shape[-1]
    layers_k = [tuple(lb) for lb in params["mlp_k"]]
    layers_q = [tuple(lb) for lb in params["mlp_q"]]
    n_layers = len(layers_k)

    # NOTE: the PyTorch module divides scores by sqrt(q.shape[1]) == sqrt(Nt)
    # (the set size, NOT d_k).  This is intentionally faithful; do not "fix".
    inv_scale = 1.0 / math.sqrt(Nt)
    # Fold 1/scale into the (ReLU-free) last layer of the query MLP on the host
    # so the kernel does not pay a (bb*Nt, dk) VPU pass every grid step.
    w_last, b_last = layers_q[-1]
    layers_q = layers_q[:-1] + [(w_last * inv_scale, b_last * inv_scale)]

    in_itemsize = jnp.dtype(compute_dtype).itemsize
    sublane = 16 if in_itemsize == 2 else 8   # packed bf16 needs 16-row tiles

    weight_bytes = 0
    weight_args, weight_specs = [], []
    for layers in (layers_k, layers_q):
        for (w, b) in layers:
            wv = jnp.asarray(w).astype(compute_dtype)
            bv = jnp.asarray(b).reshape(1, -1).astype(compute_dtype)
            weight_args += [wv, bv]
            weight_bytes += (wv.size + bv.size) * in_itemsize
            # Constant index_map -> weight block is VMEM-resident across grid.
            weight_specs += [
                pl.BlockSpec(wv.shape, lambda i: (0, 0)),
                pl.BlockSpec(bv.shape, lambda i: (0, 0)),
            ]

    num_tc, vmem_cap = _detect_tpu()
    # ~75% of physical VMEM as scoped limit (~48 MiB on v7x, ~96 MiB on v5e/v6e).
    vmem_limit = int(min(100 * 2**20, max(32 * 2**20, 0.75 * vmem_cap)))

    if batch_tile is not None:
        bb = batch_tile
    else:
        bb = _pick_batch_tile(B, Nc, Nt, F1, F2, Dv, in_itemsize, weight_bytes,
                              num_tc=num_tc, vmem_budget=int(0.7 * vmem_limit),
                              sublane=sublane)
    if B % bb != 0 or (bb != B and ((bb * Nc) % sublane or (bb * Nt) % sublane)):
        bb = B      # fall back to one full-batch step (blocks == full dims)

    # MLP hot path on flattened (batch*set, feature) 2-D tiles.
    x1f = x1.reshape(B * Nc, F1).astype(compute_dtype)
    x2f = x2.reshape(B * Nt, F2).astype(compute_dtype)
    rv = r.astype(compute_dtype)

    kernel = functools.partial(
        _fused_attention_kernel,
        n_layers=n_layers, bb=bb, nc=Nc, nt=Nt,
        normalise=normalise, compute_dtype=compute_dtype,
        approx_recip=approx_reciprocal)

    # Advisory cost estimate so XLA schedules surrounding ops sensibly.
    dk = int(layers_k[-1][0].shape[1])
    mlp_flops = 2 * B * (Nc + Nt) * sum(int(w.shape[0]) * int(w.shape[1])
                                        for (w, _) in layers_k)
    attn_flops = 2 * B * Nt * Nc * (dk + Dv)
    bytes_accessed = ((x1f.size + x2f.size + rv.size) * in_itemsize
                      + B * Nt * Dv * 4 + weight_bytes)
    cost = pl.CostEstimate(flops=mlp_flops + attn_flops,
                           transcendentals=B * Nt * Nc,
                           bytes_accessed=bytes_accessed)

    # TODO(synk): for large Nc/Nt add a second grid axis over Nt and an
    # Nc-chunked online-softmax reduction (flash-style) so the (Nt x Nc) score
    # tile stays within v7x's 64 MiB VMEM.
    return pl.pallas_call(
        kernel,
        out_shape=jax.ShapeDtypeStruct((B, Nt, Dv), jnp.float32),
        grid=(B // bb,),
        in_specs=[
            pl.BlockSpec((bb * Nc, F1), lambda i: (i, 0)),
            pl.BlockSpec((bb * Nt, F2), lambda i: (i, 0)),
            pl.BlockSpec((bb, Nc, Dv), lambda i: (i, 0, 0)),
            *weight_specs,
        ],
        out_specs=pl.BlockSpec((bb, Nt, Dv), lambda i: (i, 0, 0)),
        compiler_params=pltpu.CompilerParams(
            dimension_semantics=("parallel",),
            vmem_limit_bytes=vmem_limit),
        cost_estimate=cost,
    )(x1f, x2f, rv, *weight_args)


# ---------------------------------------------------------------------------
# Parameter init (deterministic, mirrors nn.Linear + xavier_uniform_)
# ---------------------------------------------------------------------------
def _init_mlp(key, output_sizes):
    layers = []
    for i in range(len(output_sizes) - 1):
        fan_in, fan_out = output_sizes[i], output_sizes[i + 1]
        key, kw, kb = jax.random.split(key, 3)
        limit = math.sqrt(6.0 / (fan_in + fan_out))          # xavier_uniform_
        w = jax.random.uniform(kw, (fan_in, fan_out), jnp.float32, -limit, limit)
        b_bound = 1.0 / math.sqrt(fan_in)                    # PyTorch bias default
        b = jax.random.uniform(kb, (fan_out,), jnp.float32, -b_bound, b_bound)
        layers.append((w, b))
    return layers


def init_params(key, output_sizes):
    k1, k2 = jax.random.split(key)
    return {
        "mlp_k": _init_mlp(k1, output_sizes),   # linear_layers_list  (keys, x1)
        "mlp_q": _init_mlp(k2, output_sizes),   # linear_layers_list2 (queries, x2)
    }


# ---------------------------------------------------------------------------
# Pure-JAX reference (mirrors the PyTorch forward exactly)
# ---------------------------------------------------------------------------
def attention_reference(params, x1, x2, r, normalise=True):
    def mlp(x, layers):
        B, N, F = x.shape
        h = x.reshape(B * N, F)
        for i, (w, b) in enumerate(layers):
            h = h @ w + b
            if i < len(layers) - 1:
                h = jnp.maximum(h, 0.0)
        return h.reshape(B, N, -1)

    k = mlp(x1, params["mlp_k"])
    q = mlp(x2, params["mlp_q"])
    scale = jnp.sqrt(jnp.float32(q.shape[1]))       # sqrt(Nt): PyTorch quirk
    unnorm = jnp.einsum("bjk,bik->bij", k, q) / scale
    if normalise:
        w = jax.nn.softmax(unnorm, axis=2)
    else:
        w = jax.nn.sigmoid(unnorm)
    return jnp.einsum("bik,bkj->bij", w, r)


# ---------------------------------------------------------------------------
if __name__ == "__main__":
    key = jax.random.PRNGKey(0)
    B, Nc, Nt = 4, 16, 16
    output_sizes = [32, 64, 32]
    d_v = 32

    k1, k2, k3, kp = jax.random.split(key, 4)
    x1 = jax.random.normal(k1, (B, Nc, output_sizes[0]), jnp.float32)  # keys (context x)
    x2 = jax.random.normal(k2, (B, Nt, output_sizes[0]), jnp.float32)  # queries (target x)
    r = jax.random.normal(k3, (B, Nc, d_v), jnp.float32)               # values

    params = init_params(kp, output_sizes)

    out = attention_forward(params, x1, x2, r, normalise=True)
    out = jax.block_until_ready(out)

    ref = attention_reference(params, x1, x2, r, normalise=True)
    assert out.shape == (B, Nt, d_v)
    # Tolerance accounts for the EUP approximate reciprocal in the softmax
    # denominator and the host-side scale folding; everything else is f32.
    assert jnp.allclose(out, ref, atol=2e-3, rtol=2e-3), "mismatch vs reference"

    print("KERNEL_OK")
</pallas_src>

<mosaic_0001>
module attributes {stable_mosaic.version = 11 : i64} {
  func.func @_fused_attention_kernel(%arg0: i32, %arg1: memref<64x32xf32, #tpu.memory_space<vmem>>, %arg2: memref<64x32xf32, #tpu.memory_space<vmem>>, %arg3: memref<4x16x32xf32, #tpu.memory_space<vmem>>, %arg4: memref<32x64xf32, #tpu.memory_space<vmem>>, %arg5: memref<1x64xf32, #tpu.memory_space<vmem>>, %arg6: memref<64x32xf32, #tpu.memory_space<vmem>>, %arg7: memref<1x32xf32, #tpu.memory_space<vmem>>, %arg8: memref<32x64xf32, #tpu.memory_space<vmem>>, %arg9: memref<1x64xf32, #tpu.memory_space<vmem>>, %arg10: memref<64x32xf32, #tpu.memory_space<vmem>>, %arg11: memref<1x32xf32, #tpu.memory_space<vmem>>, %arg12: memref<4x16x32xf32, #tpu.memory_space<vmem>>) attributes {dimension_semantics = [#tpu.dimension_semantics<parallel>], iteration_bounds = array<i64: 1>, scalar_prefetch = 0 : i64, scratch_operands = 0 : i64, tpu.core_type = #tpu.core_type<tc>, window_params = [{transform_indices = @transform_0, window_bounds = array<i64: 64, 32>}, {transform_indices = @transform_1, window_bounds = array<i64: 64, 32>}, {transform_indices = @transform_2, window_bounds = array<i64: 4, 16, 32>}, {pipeline_mode = #tpu.pipeline_mode<synchronous>, transform_indices = @transform_3, window_bounds = array<i64: 32, 64>}, {pipeline_mode = #tpu.pipeline_mode<synchronous>, transform_indices = @transform_4, window_bounds = array<i64: 1, 64>}, {pipeline_mode = #tpu.pipeline_mode<synchronous>, transform_indices = @transform_5, window_bounds = array<i64: 64, 32>}, {pipeline_mode = #tpu.pipeline_mode<synchronous>, transform_indices = @transform_6, window_bounds = array<i64: 1, 32>}, {pipeline_mode = #tpu.pipeline_mode<synchronous>, transform_indices = @transform_7, window_bounds = array<i64: 32, 64>}, {pipeline_mode = #tpu.pipeline_mode<synchronous>, transform_indices = @transform_8, window_bounds = array<i64: 1, 64>}, {pipeline_mode = #tpu.pipeline_mode<synchronous>, transform_indices = @transform_9, window_bounds = array<i64: 64, 32>}, {pipeline_mode = #tpu.pipeline_mode<synchronous>, transform_indices = @transform_10, window_bounds = array<i64: 1, 32>}, {transform_indices = @transform_11, window_bounds = array<i64: 4, 16, 32>}]} {
    %c0 = arith.constant 0 : index
    %c0_0 = arith.constant 0 : index
    %0 = vector.load %arg1[%c0, %c0_0] : memref<64x32xf32, #tpu.memory_space<vmem>>, vector<64x32xf32>
    %c0_1 = arith.constant 0 : index
    %c0_2 = arith.constant 0 : index
    %1 = vector.load %arg4[%c0_1, %c0_2] : memref<32x64xf32, #tpu.memory_space<vmem>>, vector<32x64xf32>
    %c0_3 = arith.constant 0 : index
    %c0_4 = arith.constant 0 : index
    %2 = vector.load %arg5[%c0_3, %c0_4] : memref<1x64xf32, #tpu.memory_space<vmem>>, vector<1x64xf32>
    %cst = arith.constant dense<0.000000e+00> : vector<64x64xf32>
    %3 = tpu.matmul %0, %1, %cst {dimension_numbers = #tpu.dot_dimension_numbers<[1], [0], [0], [1], [0, 0, 1, 1], [], []>} : vector<64x32xf32>, vector<32x64xf32>, vector<64x64xf32> -> vector<64x64xf32>
    %4 = vector.broadcast %2 : vector<1x64xf32> to vector<64x64xf32>
    %5 = arith.addf %3, %4 : vector<64x64xf32>
    %cst_5 = arith.constant 0.000000e+00 : f32
    %6 = vector.broadcast %cst_5 : f32 to vector<64x64xf32>
    %7 = arith.maximumf %5, %6 : vector<64x64xf32>
    %c0_6 = arith.constant 0 : index
    %c0_7 = arith.constant 0 : index
    %8 = vector.load %arg6[%c0_6, %c0_7] : memref<64x32xf32, #tpu.memory_space<vmem>>, vector<64x32xf32>
    %c0_8 = arith.constant 0 : index
    %c0_9 = arith.constant 0 : index
    %9 = vector.load %arg7[%c0_8, %c0_9] : memref<1x32xf32, #tpu.memory_space<vmem>>, vector<1x32xf32>
    %cst_10 = arith.constant dense<0.000000e+00> : vector<64x32xf32>
    %10 = tpu.matmul %7, %8, %cst_10 {dimension_numbers = #tpu.dot_dimension_numbers<[1], [0], [0], [1], [0, 0, 1, 1], [], []>} : vector<64x64xf32>, vector<64x32xf32>, vector<64x32xf32> -> vector<64x32xf32>
    %11 = vector.broadcast %9 : vector<1x32xf32> to vector<64x32xf32>
    %12 = arith.addf %10, %11 : vector<64x32xf32>
    %c0_11 = arith.constant 0 : index
    %c0_12 = arith.constant 0 : index
    %13 = vector.load %arg2[%c0_11, %c0_12] : memref<64x32xf32, #tpu.memory_space<vmem>>, vector<64x32xf32>
    %c0_13 = arith.constant 0 : index
    %c0_14 = arith.constant 0 : index
    %14 = vector.load %arg8[%c0_13, %c0_14] : memref<32x64xf32, #tpu.memory_space<vmem>>, vector<32x64xf32>
    %c0_15 = arith.constant 0 : index
    %c0_16 = arith.constant 0 : index
    %15 = vector.load %arg9[%c0_15, %c0_16] : memref<1x64xf32, #tpu.memory_space<vmem>>, vector<1x64xf32>
    %cst_17 = arith.constant dense<0.000000e+00> : vector<64x64xf32>
    %16 = tpu.matmul %13, %14, %cst_17 {dimension_numbers = #tpu.dot_dimension_numbers<[1], [0], [0], [1], [0, 0, 1, 1], [], []>} : vector<64x32xf32>, vector<32x64xf32>, vector<64x64xf32> -> vector<64x64xf32>
    %17 = vector.broadcast %15 : vector<1x64xf32> to vector<64x64xf32>
    %18 = arith.addf %16, %17 : vector<64x64xf32>
    %cst_18 = arith.constant 0.000000e+00 : f32
    %19 = vector.broadcast %cst_18 : f32 to vector<64x64xf32>
    %20 = arith.maximumf %18, %19 : vector<64x64xf32>
    %c0_19 = arith.constant 0 : index
    %c0_20 = arith.constant 0 : index
    %21 = vector.load %arg10[%c0_19, %c0_20] : memref<64x32xf32, #tpu.memory_space<vmem>>, vector<64x32xf32>
    %c0_21 = arith.constant 0 : index
    %c0_22 = arith.constant 0 : index
    %22 = vector.load %arg11[%c0_21, %c0_22] : memref<1x32xf32, #tpu.memory_space<vmem>>, vector<1x32xf32>
    %cst_23 = arith.constant dense<0.000000e+00> : vector<64x32xf32>
    %23 = tpu.matmul %20, %21, %cst_23 {dimension_numbers = #tpu.dot_dimension_numbers<[1], [0], [0], [1], [0, 0, 1, 1], [], []>} : vector<64x64xf32>, vector<64x32xf32>, vector<64x32xf32> -> vector<64x32xf32>
    %24 = vector.broadcast %22 : vector<1x32xf32> to vector<64x32xf32>
    %25 = arith.addf %23, %24 : vector<64x32xf32>
    %26 = vector.shape_cast %12 : vector<64x32xf32> to vector<4x16x32xf32>
    %27 = vector.shape_cast %25 : vector<64x32xf32> to vector<4x16x32xf32>
    %cst_24 = arith.constant dense<0.000000e+00> : vector<4x16x16xf32>
    %28 = tpu.matmul %27, %26, %cst_24 {dimension_numbers = #tpu.dot_dimension_numbers<[2], [2], [1], [1], [0, 0, 0, 1, 1, 1], [0], [0]>} : vector<4x16x32xf32>, vector<4x16x32xf32>, vector<4x16x16xf32> -> vector<4x16x16xf32>
    %cst_25 = arith.constant dense<0xFF800000> : vector<4x16xf32>
    %29 = vector.multi_reduction <maximumf>, %28, %cst_25 [2] : vector<4x16x16xf32> to vector<4x16xf32>
    %30 = vector.shape_cast %29 : vector<4x16xf32> to vector<4x16x1xf32>
    %31 = vector.broadcast %30 : vector<4x16x1xf32> to vector<4x16x16xf32>
    %32 = arith.subf %28, %31 : vector<4x16x16xf32>
    %33 = math.exp %32 : vector<4x16x16xf32>
    %cst_26 = arith.constant dense<0.000000e+00> : vector<4x16xf32>
    %34 = vector.multi_reduction <add>, %33, %cst_26 [2] : vector<4x16x16xf32> to vector<4x16xf32>
    %35 = vector.shape_cast %34 : vector<4x16xf32> to vector<4x16x1xf32>
    %36 = tpu.reciprocal %35 {approx = true} : vector<4x16x1xf32> -> vector<4x16x1xf32>
    %37 = vector.broadcast %36 : vector<4x16x1xf32> to vector<4x16x16xf32>
    %38 = arith.mulf %33, %37 : vector<4x16x16xf32>
    %c0_27 = arith.constant 0 : index
    %c0_28 = arith.constant 0 : index
    %c0_29 = arith.constant 0 : index
    %39 = vector.load %arg3[%c0_27, %c0_28, %c0_29] : memref<4x16x32xf32, #tpu.memory_space<vmem>>, vector<4x16x32xf32>
    %cst_30 = arith.constant dense<0.000000e+00> : vector<4x16x32xf32>
    %40 = tpu.matmul %38, %39, %cst_30 {dimension_numbers = #tpu.dot_dimension_numbers<[2], [1], [1], [2], [0, 0, 0, 1, 1, 2], [0], [0]>} : vector<4x16x16xf32>, vector<4x16x32xf32>, vector<4x16x32xf32> -> vector<4x16x32xf32>
    %c0_31 = arith.constant 0 : index
    %c0_32 = arith.constant 0 : index
    %c0_33 = arith.constant 0 : index
    %41 = vector.load %arg12[%c0_31, %c0_32, %c0_33] : memref<4x16x32xf32, #tpu.memory_space<vmem>>, vector<4x16x32xf32>
    tpu.vector_store %arg12[%c0_31, %c0_32, %c0_33], %40 {strides = array<i32>} : memref<4x16x32xf32, #tpu.memory_space<vmem>>, vector<4x16x32xf32>,
    return
  }
  func.func @transform_0(%arg0: i32) -> (i32, i32) {
    %c0_i32 = arith.constant 0 : i32
    %c0_i32_0 = arith.constant 0 : i32
    return %arg0, %c0_i32 : i32, i32
  }
  func.func @transform_1(%arg0: i32) -> (i32, i32) {
    %c0_i32 = arith.constant 0 : i32
    %c0_i32_0 = arith.constant 0 : i32
    return %arg0, %c0_i32 : i32, i32
  }
  func.func @transform_2(%arg0: i32) -> (i32, i32, i32) {
    %c0_i32 = arith.constant 0 : i32
    %c0_i32_0 = arith.constant 0 : i32
    %c0_i32_1 = arith.constant 0 : i32
    return %arg0, %c0_i32, %c0_i32_0 : i32, i32, i32
  }
  func.func @transform_3(%arg0: i32) -> (i32, i32) {
    %c0_i32 = arith.constant 0 : i32
    %c0_i32_0 = arith.constant 0 : i32
    %c0_i32_1 = arith.constant 0 : i32
    return %c0_i32, %c0_i32_0 : i32, i32
  }
  func.func @transform_4(%arg0: i32) -> (i32, i32) {
    %c0_i32 = arith.constant 0 : i32
    %c0_i32_0 = arith.constant 0 : i32
    %c0_i32_1 = arith.constant 0 : i32
    return %c0_i32, %c0_i32_0 : i32, i32
  }
  func.func @transform_5(%arg0: i32) -> (i32, i32) {
    %c0_i32 = arith.constant 0 : i32
    %c0_i32_0 = arith.constant 0 : i32
    %c0_i32_1 = arith.constant 0 : i32
    return %c0_i32, %c0_i32_0 : i32, i32
  }
  func.func @transform_6(%arg0: i32) -> (i32, i32) {
    %c0_i32 = arith.constant 0 : i32
    %c0_i32_0 = arith.constant 0 : i32
    %c0_i32_1 = arith.constant 0 : i32
    return %c0_i32, %c0_i32_0 : i32, i32
  }
  func.func @transform_7(%arg0: i32) -> (i32, i32) {
    %c0_i32 = arith.constant 0 : i32
    %c0_i32_0 = arith.constant 0 : i32
    %c0_i32_1 = arith.constant 0 : i32
    return %c0_i32, %c0_i32_0 : i32, i32
  }
  func.func @transform_8(%arg0: i32) -> (i32, i32) {
    %c0_i32 = arith.constant 0 : i32
    %c0_i32_0 = arith.constant 0 : i32
    %c0_i32_1 = arith.constant 0 : i32
    return %c0_i32, %c0_i32_0 : i32, i32
  }
  func.func @transform_9(%arg0: i32) -> (i32, i32) {
    %c0_i32 = arith.constant 0 : i32
    %c0_i32_0 = arith.constant 0 : i32
    %c0_i32_1 = arith.constant 0 : i32
    return %c0_i32, %c0_i32_0 : i32, i32
  }
  func.func @transform_10(%arg0: i32) -> (i32, i32) {
    %c0_i32 = arith.constant 0 : i32
    %c0_i32_0 = arith.constant 0 : i32
    %c0_i32_1 = arith.constant 0 : i32
    return %c0_i32, %c0_i32_0 : i32, i32
  }
  func.func @transform_11(%arg0: i32) -> (i32, i32, i32) {
    %c0_i32 = arith.constant 0 : i32
    %c0_i32_0 = arith.constant 0 : i32
    %c0_i32_1 = arith.constant 0 : i32
    return %arg0, %c0_i32, %c0_i32_0 : i32, i32, i32
  }
}

</mosaic_0001>

<bundles_post_ra>
// kernel: tpu_custom_call.1
= control target key start
LH: loop header
LB: loop body
LE: loop exit
PB: predicated region body
PF: predicated region fallthrough
CT: control target
= control target key end

     0   :  { %vm55_vm0 = vcmask 261120   ;;  %s1187_s0 = inlined_call_operand.vmem [shape: f32[64,32], index: 0, kind: input, shape index: {}]   ;;  %s1188_s1 = inlined_call_operand.vmem [shape: f32[64,32], index: 1, kind: input, shape index: {}]   ;;  %s1189_s2 = inlined_call_operand.vmem [shape: f32[4,16,32], index: 2, kind: input, shape index: {}]   ;;  %s1190_s3 = inlined_call_operand.vmem [shape: f32[32,64], index: 3, kind: input, shape index: {}]   ;;  %s1191_s4 = inlined_call_operand.vmem [shape: f32[1,64], index: 4, kind: input, shape index: {}]   ;;  %s1192_s5 = inlined_call_operand.vmem [shape: f32[64,32], index: 5, kind: input, shape index: {}]   ;;  %s1193_s6 = inlined_call_operand.vmem [shape: f32[1,32], index: 6, kind: input, shape index: {}]   ;;  %s1194_s7 = inlined_call_operand.vmem [shape: f32[32,64], index: 7, kind: input, shape index: {}]   ;;  %s1195_s8 = inlined_call_operand.vmem [shape: f32[1,64], index: 8, kind: input, shape index: {}]   ;;  %s1196_s9 = inlined_call_operand.vmem [shape: f32[64,32], index: 9, kind: input, shape index: {}]   ;;  %s1197_s10 = inlined_call_operand.vmem [shape: f32[1,32], index: 10, kind: input, shape index: {}]   ;;  %s1198_s11 = inlined_call_operand.hbm [shape: f32[4,16,32], index: 11, kind: output, shape index: {}]  }
   0x1   :  { %v50_v0 = vld [vmem:[%s1190_s3 + $0x18] sm:$0xff]  ;;  %v49_v1 = vld [vmem:[%s1190_s3 + $0x10] sm:$0xff]  ;;  %v48_v4 = vld [vmem:[%s1190_s3 + $0x8] sm:$0xff] }
   0x2   :  { %v218_v2 = vld [vmem:[%s1194_s7 + $0x18] sm:$0xff]  ;;  %92 = vmatpush.msra.mxu0 %v50_v0  ;;  %v217_v3 = vld [vmem:[%s1194_s7 + $0x10] sm:$0xff]  ;;  %v216_v5 = vld [vmem:[%s1194_s7 + $0x8] sm:$0xff] }
   0x3   :  { %259 = vmatpush.msra.mxu2 %v218_v2  ;;  %v47_v6 = vld [vmem:[%s1190_s3] sm:$0xff] }
   0x4   :  { %93 = vmatpush.msra.mxu0 %v49_v1  ;;  %v215_v7 = vld [vmem:[%s1194_s7] sm:$0xff] }
   0x5   :  { %260 = vmatpush.msra.mxu2 %v217_v3  ;;  %v39_v8 = vld [vmem:[%s1187_s0] sm:$0xff] }
   0x6   :  { %94 = vmatpush.msra.mxu0 %v48_v4  ;;  %v207_v9 = vld [vmem:[%s1188_s1] sm:$0xff] }
   0x7   :  { %261 = vmatpush.msra.mxu2 %v216_v5 }
   0x8   :  { %95 = vmatpush.msra.mxu0 %v47_v6 }
   0x9   :  { %262 = vmatpush.msra.mxu2 %v215_v7 }
   0xa   :  { %16 = vsyncpa [#allocation3], 0  ;;  %752 = vmatmul.msk.f32.vlgmr.msra.gmra.mxu0 %vm55_vm0, %v39_v8  ;;  %768 = vmatmul.msk.f32.vlgmr.msra.gmra.mxu2 %vm55_vm0, %v207_v9  ;;  %v40_v10 = vld [vmem:[%s1187_s0 + $0x8] sm:$0xff]  ;;  %v41_v12 = vld [vmem:[%s1187_s0 + $0x10] sm:$0xff]  ;;  %vm141_vm1 = vcmask 523264   ;;  %vm513_vm2 = vcmask 130048  }
   0xb   :  { %v208_v11 = vld [vmem:[%s1188_s1 + $0x8] sm:$0xff]  ;;  %v209_v13 = vld [vmem:[%s1188_s1 + $0x10] sm:$0xff]  ;;  %v42_v14 = vld [vmem:[%s1187_s0 + $0x18] sm:$0xff]  ;;  %s874_s30 = smov 128   ;;  %s875_s12 = smov 8  }
   0xc   :  { %v210_v15 = vld [vmem:[%s1188_s1 + $0x18] sm:$0xff]  ;;  %v135_v17 = vld [vmem:[%s1192_s5 + $0x30] sm:$0xff]  ;;  %v134_v18 = vld [vmem:[%s1192_s5 + $0x28] sm:$0xff] }
   0xd   :  { %v136_v16 = vld [vmem:[%s1192_s5 + $0x38] sm:$0xff]  ;;  %v133_v20 = vld [vmem:[%s1192_s5 + $0x20] sm:$0xff]  ;;  %v44_v24 = vld [vmem:[%s1187_s0 + $0x28] sm:$0xff] }
   0xe   :  { %174 = vmatpush.msra.mxu1 %v136_v16  ;;  %v303_v19 = vld [vmem:[%s1196_s9 + $0x38] sm:$0xff]  ;;  %v43_v21 = vld [vmem:[%s1187_s0 + $0x20] sm:$0xff]  ;;  %v212_v25 = vld [vmem:[%s1188_s1 + $0x28] sm:$0xff] }
   0xf   :  { %340 = vmatpush.msra.mxu3 %v303_v19  ;;  %v211_v22 = vld [vmem:[%s1188_s1 + $0x20] sm:$0xff]  ;;  %v132_v23 = vld [vmem:[%s1192_s5 + $0x18] sm:$0xff]  ;;  %v45_v26 = vld [vmem:[%s1187_s0 + $0x30] sm:$0xff] }
  0x10   :  { %175 = vmatpush.msra.mxu1 %v135_v17  ;;  %v213_v27 = vld [vmem:[%s1188_s1 + $0x30] sm:$0xff]  ;;  %v46_v28 = vld [vmem:[%s1187_s0 + $0x38] sm:$0xff]  ;;  %v130_v32 = vld [vmem:[%s1192_s5 + $0x8] sm:$0xff] }
  0x11   :  { %v214_v29 = vld [vmem:[%s1188_s1 + $0x38] sm:$0xff]  ;;  %v131_v30 = vld [vmem:[%s1192_s5 + $0x10] sm:$0xff]  ;;  %v301_v33 = vld [vmem:[%s1196_s9 + $0x28] sm:$0xff] }
  0x12   :  { %753 = vmatmul.msk.f32.gmra.mxu0 %vm55_vm0, %v40_v10  ;;  %769 = vmatmul.msk.f32.gmra.mxu2 %vm55_vm0, %v208_v11  ;;  %v302_v31 = vld [vmem:[%s1196_s9 + $0x30] sm:$0xff]  ;;  %v129_v34 = vld [vmem:[%s1192_s5] sm:$0xff]  ;;  %v299_v36 = vld [vmem:[%s1196_s9 + $0x18] sm:$0xff]  ;;  %s740_s5 = sshll.u32 %s1198_s11, 4  ;;  %s741_s5 = int_to_ptr.hbm [resolvable:$true] %s740_s5 }
  0x13   :  { %176 = vmatpush.msra.mxu1 %v134_v18  ;;  %341 = vmatpush.msra.mxu3 %v302_v31  ;;  %v300_v35 = vld [vmem:[%s1196_s9 + $0x20] sm:$0xff]  ;;  %v298_v37 = vld [vmem:[%s1196_s9 + $0x10] sm:$0xff]  ;;  %v297_v38 = vld [vmem:[%s1196_s9 + $0x8] sm:$0xff] }
  0x14   :  { %v296_v39 = vld [vmem:[%s1196_s9] sm:$0xff] }
  0x15   :  { %177 = vmatpush.msra.mxu1 %v133_v20  ;;  %342 = vmatpush.msra.mxu3 %v301_v33  ;;  %v811_v40 = vld [vmem:[%s1191_s4] ss:$0 sm:$0xff] }
  0x16   :  { %v812_v44 = vld [vmem:[%s1195_s8] ss:$0 sm:$0xff] }
  0x17   :  { %178 = vmatpush.msra.mxu1 %v132_v23  ;;  %343 = vmatpush.msra.mxu3 %v300_v35 }
  0x19   :  { %179 = vmatpush.msra.mxu1 %v131_v30  ;;  %344 = vmatpush.msra.mxu3 %v299_v36  ;;  %v814_v30 = vld [vmem:[%s1197_s10] ss:$0 sm:$0xff] }
  0x1a   :  { %754 = vmatmul.msk.f32.gmra.mxu0 %vm55_vm0, %v41_v12  ;;  %770 = vmatmul.msk.f32.gmra.mxu2 %vm55_vm0, %v209_v13 }
  0x1b   :  { %180 = vmatpush.msra.mxu1 %v130_v32  ;;  %345 = vmatpush.msra.mxu3 %v298_v37 }
  0x1d   :  { %181 = vmatpush.msra.mxu1 %v129_v34  ;;  %346 = vmatpush.msra.mxu3 %v297_v38 }
  0x1f   :  { %347 = vmatpush.msra.mxu3 %v296_v39 }
  0x22   :  { %755 = vmatmul.msk.f32.gmra.mxu0 %vm55_vm0, %v42_v14  ;;  %771 = vmatmul.msk.f32.gmra.mxu2 %vm55_vm0, %v210_v15 }
  0x2a   :  { %756 = vmatmul.msk.f32.gmra.mxu0 %vm55_vm0, %v43_v21  ;;  %772 = vmatmul.msk.f32.gmra.mxu2 %vm55_vm0, %v211_v22 }
  0x32   :  { %757 = vmatmul.msk.f32.gmra.mxu0 %vm55_vm0, %v44_v24  ;;  %773 = vmatmul.msk.f32.gmra.mxu2 %vm55_vm0, %v212_v25 }
  0x3a   :  { %758 = vmatmul.msk.f32.gmra.mxu0 %vm55_vm0, %v45_v26  ;;  %774 = vmatmul.msk.f32.gmra.mxu2 %vm55_vm0, %v213_v27  ;;  %v813_v27 = vld [vmem:[%s1193_s6] ss:$0 sm:$0xff] }
  0x42   :  { %759 = vmatmul.msk.f32.gmra.mxu0 %vm55_vm0, %v46_v28  ;;  %775 = vmatmul.msk.f32.gmra.mxu2 %vm55_vm0, %v214_v29 }
  0x87   :  { %v97_v41 = vpop.f32.mrf.mxu0 }
  0x88   :  { %v98_v42 = vadd.f32 %v811_v40, %v97_v41 }
  0x8a   :  { %v121_v43 = vmax.f32 %v98_v42, 0.0 }
  0x8c   :  { %760 = vmatmul.msk.f32.vlgmr.msra.gmra.mxu1 %vm141_vm1, %v121_v43 }
  0x8d   :  { %v264_v45 = vpop.f32.mrf.mxu2 }
  0x8e   :  { %v265_v46 = vadd.f32 %v812_v44, %v264_v45 }
  0x8f   :  { %v100_v47 = vpop.f32.mrf.mxu0 }
  0x90   :  { %v101_v48 = vadd.f32 %v811_v40, %v100_v47  ;;  %v288_v49 = vmax.f32 %v265_v46, 0.0 }
  0x92   :  { %v122_v50 = vmax.f32 %v101_v48, 0.0  ;;  %776 = vmatmul.msk.f32.vlgmr.msra.gmra.mxu3 %vm141_vm1, %v288_v49 }
  0x94   :  { %761 = vmatmul.msk.f32.gmra.mxu1 %vm141_vm1, %v122_v50 }
  0x95   :  { %v267_v51 = vpop.f32.mrf.mxu2 }
  0x96   :  { %v268_v52 = vadd.f32 %v812_v44, %v267_v51 }
  0x97   :  { %v103_v53 = vpop.f32.mrf.mxu0 }
  0x98   :  { %v104_v54 = vadd.f32 %v811_v40, %v103_v53  ;;  %v289_v55 = vmax.f32 %v268_v52, 0.0 }
  0x9a   :  { %v123_v56 = vmax.f32 %v104_v54, 0.0  ;;  %777 = vmatmul.msk.f32.gmra.mxu3 %vm141_vm1, %v289_v55 }
  0x9c   :  { %762 = vmatmul.msk.f32.gmra.mxu1 %vm141_vm1, %v123_v56 }
  0x9d   :  { %v270_v57 = vpop.f32.mrf.mxu2 }
  0x9e   :  { %v271_v58 = vadd.f32 %v812_v44, %v270_v57 }
  0x9f   :  { %v106_v59 = vpop.f32.mrf.mxu0 }
  0xa0   :  { %v107_v60 = vadd.f32 %v811_v40, %v106_v59  ;;  %v290_v61 = vmax.f32 %v271_v58, 0.0 }
  0xa2   :  { %v124_v62 = vmax.f32 %v107_v60, 0.0  ;;  %778 = vmatmul.msk.f32.gmra.mxu3 %vm141_vm1, %v290_v61 }
  0xa4   :  { %763 = vmatmul.msk.f32.gmra.mxu1 %vm141_vm1, %v124_v62 }
  0xa5   :  { %v273_v63 = vpop.f32.mrf.mxu2 }
  0xa6   :  { %v274_v0 = vadd.f32 %v812_v44, %v273_v63 }
  0xa7   :  { %v109_v1 = vpop.f32.mrf.mxu0 }
  0xa8   :  { %v110_v2 = vadd.f32 %v811_v40, %v109_v1  ;;  %v291_v3 = vmax.f32 %v274_v0, 0.0 }
  0xaa   :  { %v125_v4 = vmax.f32 %v110_v2, 0.0  ;;  %779 = vmatmul.msk.f32.gmra.mxu3 %vm141_vm1, %v291_v3 }
  0xac   :  { %764 = vmatmul.msk.f32.gmra.mxu1 %vm141_vm1, %v125_v4 }
  0xad   :  { %v276_v5 = vpop.f32.mrf.mxu2 }
  0xae   :  { %v277_v6 = vadd.f32 %v812_v44, %v276_v5 }
  0xaf   :  { %v112_v7 = vpop.f32.mrf.mxu0 }
  0xb0   :  { %v113_v8 = vadd.f32 %v811_v40, %v112_v7  ;;  %v292_v9 = vmax.f32 %v277_v6, 0.0 }
  0xb2   :  { %v126_v10 = vmax.f32 %v113_v8, 0.0  ;;  %780 = vmatmul.msk.f32.gmra.mxu3 %vm141_vm1, %v292_v9 }
  0xb4   :  { %765 = vmatmul.msk.f32.gmra.mxu1 %vm141_vm1, %v126_v10 }
  0xb5   :  { %v279_v11 = vpop.f32.mrf.mxu2 }
  0xb6   :  { %v280_v12 = vadd.f32 %v812_v44, %v279_v11 }
  0xb7   :  { %v115_v13 = vpop.f32.mrf.mxu0 }
  0xb8   :  { %v116_v14 = vadd.f32 %v811_v40, %v115_v13  ;;  %v293_v15 = vmax.f32 %v280_v12, 0.0 }
  0xba   :  { %v127_v16 = vmax.f32 %v116_v14, 0.0  ;;  %781 = vmatmul.msk.f32.gmra.mxu3 %vm141_vm1, %v293_v15 }
  0xbc   :  { %766 = vmatmul.msk.f32.gmra.mxu1 %vm141_vm1, %v127_v16 }
  0xbd   :  { %v282_v17 = vpop.f32.mrf.mxu2 }
  0xbe   :  { %v283_v18 = vadd.f32 %v812_v44, %v282_v17 }
  0xbf   :  { %v118_v19 = vpop.f32.mrf.mxu0 }
  0xc0   :  { %v119_v20 = vadd.f32 %v811_v40, %v118_v19  ;;  %v294_v21 = vmax.f32 %v283_v18, 0.0 }
  0xc2   :  { %v128_v22 = vmax.f32 %v119_v20, 0.0  ;;  %782 = vmatmul.msk.f32.gmra.mxu3 %vm141_vm1, %v294_v21 }
  0xc4   :  { %767 = vmatmul.msk.f32.gmra.mxu1 %vm141_vm1, %v128_v22 }
  0xc5   :  { %v285_v23 = vpop.f32.mrf.mxu2 }
  0xc6   :  { %v286_v24 = vadd.f32 %v812_v44, %v285_v23 }
  0xc8   :  { %v295_v25 = vmax.f32 %v286_v24, 0.0 }
  0xca   :  { %783 = vmatmul.msk.f32.gmra.mxu3 %vm141_vm1, %v295_v25 }
 0x109   :  { %v183_v26 = vpop.f32.mrf.mxu1 }
 0x10a   :  { %v184_v32 = vadd.f32 %v813_v27, %v183_v26 }
 0x111   :  { %v186_v28 = vpop.f32.mrf.mxu1 }
 0x112   :  { %v187_v29 = vadd.f32 %v813_v27, %v186_v28 }
 0x114   :  { %784 = vmatpush.xpose.msk.msrb.mxu0 %vm55_vm0, %v187_v29 }
 0x115   :  { %v349_v31 = vpop.f32.mrf.mxu3 }
 0x116   :  { %v350_v33 = vadd.f32 %v814_v30, %v349_v31 }
 0x118   :  { %785 = vmatpush.xpose.msk.msrb.mxu0 %vm55_vm0, %v184_v32 }
 0x119   :  { %v189_v34 = vpop.f32.mrf.mxu1 }
 0x11a   :  { %v190_v40 = vadd.f32 %v813_v27, %v189_v34 }
 0x11b   :  { %786 = vmatmul.msk.f32.vlgmr.msrb.gmra.mxu0 %vm55_vm0, %v350_v33 }
 0x11d   :  { %v352_v35 = vpop.f32.mrf.mxu3 }
 0x11e   :  { %v353_v36 = vadd.f32 %v814_v30, %v352_v35 }
 0x121   :  { %v192_v37 = vpop.f32.mrf.mxu1 }
 0x122   :  { %v193_v38 = vadd.f32 %v813_v27, %v192_v37 }
 0x123   :  { %787 = vmatmul.msk.f32.gmra.mxu0 %vm55_vm0, %v353_v36 }
 0x124   :  { %788 = vmatpush.xpose.msk.msrb.mxu2 %vm55_vm0, %v193_v38 }
 0x125   :  { %v355_v39 = vpop.f32.mrf.mxu3 }
 0x126   :  { %v356_v41 = vadd.f32 %v814_v30, %v355_v39 }
 0x128   :  { %789 = vmatpush.xpose.msk.msrb.mxu2 %vm55_vm0, %v190_v40 }
 0x129   :  { %v195_v42 = vpop.f32.mrf.mxu1 }
 0x12a   :  { %v196_v48 = vadd.f32 %v813_v27, %v195_v42 }
 0x12b   :  { %790 = vmatmul.msk.f32.vlgmr.msrb.gmra.mxu2 %vm55_vm0, %v356_v41 }
 0x12d   :  { %v358_v43 = vpop.f32.mrf.mxu3 }
 0x12e   :  { %v359_v44 = vadd.f32 %v814_v30, %v358_v43 }
 0x131   :  { %v198_v45 = vpop.f32.mrf.mxu1 }
 0x132   :  { %v199_v46 = vadd.f32 %v813_v27, %v198_v45 }
 0x133   :  { %791 = vmatmul.msk.f32.gmra.mxu2 %vm55_vm0, %v359_v44 }
 0x134   :  { %792 = vmatpush.xpose.msk.msrb.mxu1 %vm55_vm0, %v199_v46 }
 0x135   :  { %v361_v47 = vpop.f32.mrf.mxu3 }
 0x136   :  { %v362_v49 = vadd.f32 %v814_v30, %v361_v47 }
 0x138   :  { %793 = vmatpush.xpose.msk.msrb.mxu1 %vm55_vm0, %v196_v48 }
 0x139   :  { %v201_v50 = vpop.f32.mrf.mxu1 }
 0x13a   :  { %v202_v56 = vadd.f32 %v813_v27, %v201_v50 }
 0x13b   :  { %794 = vmatmul.msk.f32.vlgmr.msrb.gmra.mxu1 %vm55_vm0, %v362_v49 }
 0x13d   :  { %v364_v51 = vpop.f32.mrf.mxu3 }
 0x13e   :  { %v365_v52 = vadd.f32 %v814_v30, %v364_v51 }
 0x141   :  { %v204_v53 = vpop.f32.mrf.mxu1 }
 0x142   :  { %v205_v54 = vadd.f32 %v813_v27, %v204_v53  ;;  %v602_v53 = vld [vmem:[%s1189_s2] sm:$0xff] }
 0x143   :  { %795 = vmatmul.msk.f32.gmra.mxu1 %vm55_vm0, %v365_v52  ;;  %v603_v52 = vld [vmem:[%s1189_s2 + $0x8] sm:$0xff] }
 0x144   :  { %796 = vmatpush.xpose.msk.msrb.mxu3 %vm55_vm0, %v205_v54  ;;  %630 = vmatpush.msra.mxu0 %v603_v52  ;;  %v605_v54 = vld [vmem:[%s1189_s2 + $0x18] sm:$0xff] }
 0x145   :  { %v367_v55 = vpop.f32.mrf.mxu3  ;;  %659 = vmatpush.msra.mxu2 %v605_v54 }
 0x146   :  { %v368_v57 = vadd.f32 %v814_v30, %v367_v55  ;;  %631 = vmatpush.msra.mxu0 %v602_v53  ;;  %v604_v55 = vld [vmem:[%s1189_s2 + $0x10] sm:$0xff] }
 0x147   :  { %660 = vmatpush.msra.mxu2 %v604_v55 }
 0x148   :  { %797 = vmatpush.xpose.msk.msrb.mxu3 %vm55_vm0, %v202_v56 }
 0x14b   :  { %798 = vmatmul.msk.f32.vlgmr.msrb.gmra.mxu3 %vm55_vm0, %v368_v57 }
 0x14d   :  { %v370_v58 = vpop.f32.mrf.mxu3 }
 0x14e   :  { %v371_v59 = vadd.f32 %v814_v30, %v370_v58  ;;  %v607_v58 = vld [vmem:[%s1189_s2 + $0x28] sm:$0xff] }
 0x14f   :  { %688 = vmatpush.msra.mxu1 %v607_v58 }
 0x153   :  { %799 = vmatmul.msk.f32.gmra.mxu3 %vm55_vm0, %v371_v59 }
 0x198   :  { %v402_v60 = vpop.f32.mrf.mxu0 }
 0x199   :  { %v514_v61 = vsel %vm513_vm2, %v402_v60, -inf }
 0x19a   :  { %515 = vmax.xlane.f32.xlu1 %v514_v61 }
 0x1a0   :  { %v405_v8 = vpop.f32.mrf.mxu0 }
 0x1a1   :  { %v517_v11 = vsel %vm513_vm2, %v405_v8, -inf }
 0x1ae   :  { %v437_v62 = vpop.f32.mrf.mxu2 }
 0x1af   :  { %v520_v63 = vsel %vm513_vm2, %v437_v62, -inf }
 0x1b0   :  { %521 = vmax.xlane.f32.xlu0 %v520_v63  ;;  %v609_v63 = vld [vmem:[%s1189_s2 + $0x38] sm:$0xff] }
 0x1b1   :  { %717 = vmatpush.msra.mxu3 %v609_v63 }
 0x1b6   :  { %v440_v0 = vpop.f32.mrf.mxu2 }
 0x1b7   :  { %v523_v1 = vsel %vm513_vm2, %v440_v0, -inf }
 0x1b8   :  { %v472_v2 = vpop.f32.mrf.mxu1  ;;  %524 = vmax.xlane.f32.xlu2 %v523_v1 }
 0x1b9   :  { %v526_v3 = vsel %vm513_vm2, %v472_v2, -inf }
 0x1ba   :  { %527 = vmax.xlane.f32.xlu1 %v526_v3 }
 0x1c0   :  { %v475_v4 = vpop.f32.mrf.mxu1 }
 0x1c1   :  { %v529_v5 = vsel %vm513_vm2, %v475_v4, -inf }
 0x1c2   :  { %530 = vmax.xlane.f32.xlu1 %v529_v5 }
 0x1ce   :  { %v507_v6 = vpop.f32.mrf.mxu3 }
 0x1cf   :  { %v532_v7 = vsel %vm513_vm2, %v507_v6, -inf }
 0x1d0   :  { %533 = vmax.xlane.f32.xlu0 %v532_v7 }
 0x1d6   :  { %v510_v9 = vpop.f32.mrf.mxu3 }
 0x1d7   :  { %v535_v10 = vsel %vm513_vm2, %v510_v9, -inf }
 0x1d8   :  { %536 = vmax.xlane.f32.xlu2 %v535_v10  ;;  %518 = vmax.xlane.f32.xlu0 %v517_v11 }
 0x20d   :  { %v516_v12 = vpop.xlane.xlu1 %515 }
 0x20e   :  { %v538_v13 = vsub.f32 %v402_v60, %v516_v12  ;;  %v606_v60 = vld [vmem:[%s1189_s2 + $0x20] sm:$0xff] }
 0x20f   :  { %689 = vmatpush.msra.mxu1 %v606_v60 }
 0x210   :  { %v546_v14 = vmul.f32 1.442695, %v538_v13 }
 0x212   :  { %815 = vpow2.f32 %v546_v14 }
 0x218   :  { %v1124_v15 = vpop.eup %815 }
 0x219   :  { %v562_v16 = vsel %vm513_vm2, %v1124_v15, 0.0 }
 0x21a   :  { %563 = vadd.xlane.f32.xlu1 %v562_v16 }
 0x223   :  { %v522_v17 = vpop.xlane.xlu0 %521 }
 0x224   :  { %v540_v18 = vsub.f32 %v437_v62, %v522_v17 }
 0x226   :  { %v550_v19 = vmul.f32 1.442695, %v540_v18 }
 0x228   :  { %817 = vpow2.f32 %v550_v19 }
 0x22b   :  { %v525_v27 = vpop.xlane.xlu2 %524 }
 0x22c   :  { %v541_v30 = vsub.f32 %v440_v0, %v525_v27 }
 0x22d   :  { %v528_v20 = vpop.xlane.xlu1 %527 }
 0x22e   :  { %v1128_v21 = vpop.eup %817  ;;  %v542_v22 = vsub.f32 %v472_v2, %v528_v20  ;;  %v552_v32 = vmul.f32 1.442695, %v541_v30  ;;  %v608_v2 = vld [vmem:[%s1189_s2 + $0x30] sm:$0xff]  ;;  %s873_s2 = smov [#allocation2]  }
 0x22f   :  { %v568_v23 = vsel %vm513_vm2, %v1128_v21, 0.0  ;;  %718 = vmatpush.msra.mxu3 %v608_v2  ;;  %s738_s27 = sshll.u32 %s873_s2, 4  ;;  %s739_s27 = int_to_ptr.vmem [resolvable:$true] %s738_s27 }
 0x230   :  { %v554_v24 = vmul.f32 1.442695, %v542_v22  ;;  %569 = vadd.xlane.f32.xlu2 %v568_v23 }
 0x232   :  { %819 = vpow2.f32 %v554_v24 }
 0x235   :  { %v531_v33 = vpop.xlane.xlu1 %530 }
 0x236   :  { %v543_v39 = vsub.f32 %v475_v4, %v531_v33 }
 0x238   :  { %v1132_v25 = vpop.eup %819  ;;  %v556_v43 = vmul.f32 1.442695, %v543_v39 }
 0x239   :  { %v574_v26 = vsel %vm513_vm2, %v1132_v25, 0.0 }
 0x23a   :  { %575 = vadd.xlane.f32.xlu2 %v574_v26 }
 0x243   :  { %v534_v28 = vpop.xlane.xlu0 %533 }
 0x244   :  { %v544_v29 = vsub.f32 %v507_v6, %v534_v28 }
 0x246   :  { %v558_v31 = vmul.f32 1.442695, %v544_v29 }
 0x248   :  { %821 = vpow2.f32 %v558_v31 }
 0x249   :  { %823 = vpow2.f32 %v552_v32 }
 0x24b   :  { %v537_v34 = vpop.xlane.xlu2 %536  ;;  %v519_v35 = vpop.xlane.xlu0 %518 }
 0x24c   :  { %v545_v36 = vsub.f32 %v510_v9, %v537_v34  ;;  %v539_v37 = vsub.f32 %v405_v8, %v519_v35 }
 0x24e   :  { %v822_v38 = vpop.eup %821  ;;  %v560_v40 = vmul.f32 1.442695, %v545_v36  ;;  %v548_v41 = vmul.f32 1.442695, %v539_v37 }
 0x24f   :  { %v580_v42 = vsel %vm513_vm2, %v822_v38, 0.0  ;;  %v824_v44 = vpop.eup %823 }
 0x250   :  { %825 = vpow2.f32 %v560_v40  ;;  %581 = vadd.xlane.f32.xlu0 %v580_v42  ;;  %v571_v48 = vsel %vm513_vm2, %v824_v44, 0.0 }
 0x251   :  { %827 = vpow2.f32 %v548_v41 }
 0x252   :  { %829 = vpow2.f32 %v556_v43 }
 0x256   :  { %v826_v45 = vpop.eup %825 }
 0x257   :  { %v828_v46 = vpop.eup %827  ;;  %v583_v47 = vsel %vm513_vm2, %v826_v45, 0.0 }
 0x258   :  { %584 = vadd.xlane.f32.xlu1 %v583_v47  ;;  %572 = vadd.xlane.f32.xlu0 %v571_v48  ;;  %v565_v49 = vsel %vm513_vm2, %v828_v46, 0.0  ;;  %v830_v50 = vpop.eup %829 }
 0x259   :  { %566 = vadd.xlane.f32.xlu2 %v565_v49  ;;  %v577_v51 = vsel %vm513_vm2, %v830_v50, 0.0 }
 0x260   :  { %578 = vadd.xlane.f32.xlu0 %v577_v51 }
 0x28d   :  { %v564_v56 = vpop.xlane.xlu1 %563 }
 0x28e   :  { %831 = vrcp.f32 %v564_v56 }
 0x294   :  { %v832_v57 = vpop.eup %831 }
 0x295   :  { %v594_v59 = vmul.f32 %v832_v57, %v1124_v15 }
 0x297   :  { %800 = vmatmul.msk.f32.vlgmr.msra.gmra.mxu0 %vm513_vm2, %v594_v59 }
 0x2a3   :  { %v570_v61 = vpop.xlane.xlu2 %569 }
 0x2a4   :  { %833 = vrcp.f32 %v570_v61 }
 0x2aa   :  { %v834_v62 = vpop.eup %833 }
 0x2ab   :  { %v596_v0 = vmul.f32 %v834_v62, %v1128_v21 }
 0x2ad   :  { %802 = vmatmul.msk.f32.vlgmr.msra.gmra.mxu2 %vm513_vm2, %v596_v0  ;;  %v576_v1 = vpop.xlane.xlu2 %575 }
 0x2ae   :  { %835 = vrcp.f32 %v576_v1 }
 0x2b4   :  { %v836_v3 = vpop.eup %835 }
 0x2b5   :  { %v598_v4 = vmul.f32 %v836_v3, %v1132_v25 }
 0x2b7   :  { %804 = vmatmul.msk.f32.vlgmr.msra.gmra.mxu1 %vm513_vm2, %v598_v4 }
 0x2c3   :  { %v582_v5 = vpop.xlane.xlu0 %581 }
 0x2c4   :  { %837 = vrcp.f32 %v582_v5 }
 0x2ca   :  { %v838_v6 = vpop.eup %837 }
 0x2cb   :  { %v600_v7 = vmul.f32 %v838_v6, %v822_v38  ;;  %v585_v8 = vpop.xlane.xlu1 %584  ;;  %v573_v9 = vpop.xlane.xlu0 %572 }
 0x2cc   :  { %839 = vrcp.f32 %v585_v8  ;;  %v567_v10 = vpop.xlane.xlu2 %566 }
 0x2cd   :  { %841 = vrcp.f32 %v567_v10  ;;  %806 = vmatmul.msk.f32.vlgmr.msra.gmra.mxu3 %vm513_vm2, %v600_v7 }
 0x2ce   :  { %843 = vrcp.f32 %v573_v9 }
 0x2d2   :  { %v840_v11 = vpop.eup %839 }
 0x2d3   :  { %v842_v12 = vpop.eup %841  ;;  %v579_v13 = vpop.xlane.xlu0 %578  ;;  %v601_v14 = vmul.f32 %v840_v11, %v826_v45 }
 0x2d4   :  { %v844_v15 = vpop.eup %843  ;;  %845 = vrcp.f32 %v579_v13  ;;  %v595_v16 = vmul.f32 %v842_v12, %v828_v46 }
 0x2d5   :  { %v597_v17 = vmul.f32 %v844_v15, %v824_v44  ;;  %807 = vmatmul.msk.f32.gmra.mxu3 %vm513_vm2, %v601_v14 }
 0x2d6   :  { %801 = vmatmul.msk.f32.gmra.mxu0 %vm513_vm2, %v595_v16 }
 0x2d7   :  { %803 = vmatmul.msk.f32.gmra.mxu2 %vm513_vm2, %v597_v17 }
 0x2da   :  { %v846_v18 = vpop.eup %845 }
 0x2db   :  { %v599_v19 = vmul.f32 %v846_v18, %v830_v50 }
 0x2dd   :  { %805 = vmatmul.msk.f32.gmra.mxu1 %vm513_vm2, %v599_v19 }
 0x314   :  { %v633_v20 = vpop.f32.mrf.mxu0 }
 0x315   :  { %726 = vst.msk [vmem:[#allocation2] sm:$0xff] %vm55_vm0, %v633_v20 }
 0x330   :  { %v662_v21 = vpop.f32.mrf.mxu2 }
 0x331   :  { %728 = vst.msk [vmem:[#allocation2 + $0x10] sm:$0xff] %vm55_vm0, %v662_v21 }
 0x334   :  { %v691_v22 = vpop.f32.mrf.mxu1 }
 0x335   :  { %730 = vst.msk [vmem:[#allocation2 + $0x20] sm:$0xff] %vm55_vm0, %v691_v22 }
 0x350   :  { %v720_v23 = vpop.f32.mrf.mxu3 }
 0x351   :  { %732 = vst.msk [vmem:[#allocation2 + $0x30] sm:$0xff] %vm55_vm0, %v720_v23 }
 0x353   :  { %v636_v24 = vpop.f32.mrf.mxu0 }
 0x354   :  { %727 = vst.msk [vmem:[#allocation2 + $0x8] sm:$0xff] %vm55_vm0, %v636_v24 }
 0x358   :  { %v723_v25 = vpop.f32.mrf.mxu3 }
 0x359   :  { %733 = vst.msk [vmem:[#allocation2 + $0x38] sm:$0xff] %vm55_vm0, %v723_v25 }
 0x35a   :  { %v665_v26 = vpop.f32.mrf.mxu2  ;;  %v694_v27 = vpop.f32.mrf.mxu1 }
 0x35b   :  { %729 = vst.msk [vmem:[#allocation2 + $0x18] sm:$0xff] %vm55_vm0, %v665_v26 }
 0x35c   :  { %731 = vst.msk [vmem:[#allocation2 + $0x28] sm:$0xff] %vm55_vm0, %v694_v27 }
 0x35d   :  { %746 = dma.vmem_to_hbm [thread:$0]  %s739_s27, 1024, %s741_s5, [#allocation3], %s874_s30, %s874_s30, %s875_s12  }
 0x35e   :  { %871 = dma.done.wait [#allocation3], 1024  }
 0x35f   :  { %872 = vsyncadd [#allocation3], 4294966272 }
 0x360   :  { %751 = vsyncpa [#allocation3], 1 }

</bundles_post_ra>
